<compile_context>
chip_gen: v7x
topology: tpu7x:2x2x1
jax: 0.10.0
libtpu: 0.0.40
codegen_flags: <defaults>
</compile_context>

<pallas_src>
import functools

import jax
import jax.numpy as jnp
from jax.experimental import pallas as pl
from jax.experimental.pallas import tpu as pltpu


# ----------------------------------------------------------------------------
# Helpers
# ----------------------------------------------------------------------------
def _sublane_multiple(dtype) -> int:
    """Minimum second-minor tile multiple for this dtype on TPU."""
    itemsize = jnp.dtype(dtype).itemsize
    return {4: 8, 2: 16, 1: 32}.get(itemsize, 8)


def _round_up(x: int, m: int) -> int:
    return pl.cdiv(x, m) * m


# ----------------------------------------------------------------------------
# Kernel
# ----------------------------------------------------------------------------
def _make_mlp_kernel(n_layers, activation, compute_dtype):
    """Builds a kernel taking (x_ref, w0, b0, w1, b1, ..., o_ref).

    Matmuls run in the native parameter/activation dtype (bf16 stays bf16 on
    the MXU) with f32 accumulation; bias-add + activation run in f32.
    """

    def kernel(*refs):
        x_ref = refs[0]
        o_ref = refs[-1]
        h = x_ref[...]                                   # native dtype
        for l in range(n_layers):
            w = refs[1 + 2 * l][...]                     # [D_in, D_out]
            b = refs[2 + 2 * l][...]                     # [1, D_out]
            z = jnp.dot(h, w, preferred_element_type=jnp.float32)
            z = z + b.astype(jnp.float32)
            a = activation(z)                            # acti() after every Linear (f32)
            # Feed next matmul in native compute dtype (no-op for f32).
            h = a.astype(compute_dtype) if l + 1 < n_layers else a
        o_ref[...] = h.astype(o_ref.dtype)

    return kernel


# ----------------------------------------------------------------------------
# Wrapper
# ----------------------------------------------------------------------------
def neunet_forward(x, weights_t, biases, *, activation=jnp.tanh, tm=None):
    """Runs the fused MLP forward pass.

    x:         [B, arr[0]]
    weights_t: list of [arr[i], arr[i+1]]  (already transposed vs. PyTorch)
    biases:    list of [1, arr[i+1]]
    """
    B, d0 = x.shape
    n_layers = len(weights_t)
    d_out = weights_t[-1].shape[1]
    dtype = x.dtype
    sub = _sublane_multiple(dtype)

    # ---- lane-dense output: pad the last layer's output width to 128*k ------
    d_out_pad = _round_up(d_out, 128)
    weights_t = list(weights_t)
    biases = list(biases)
    if d_out_pad != d_out:
        pad = d_out_pad - d_out
        weights_t[-1] = jnp.pad(weights_t[-1], ((0, 0), (0, pad)))
        biases[-1] = jnp.pad(biases[-1], ((0, 0), (0, pad)))

    # ---- batch tiling: one big tile for small B, 256-row tiles otherwise ----
    if tm is None:
        tm = min(_round_up(max(B, 1), sub), 256)
    tm = _round_up(tm, sub)
    B_pad = _round_up(B, tm)
    if B_pad != B:
        x = jnp.pad(x, ((0, B_pad - B), (0, 0)))
    grid = (B_pad // tm,)

    # ---- specs ---------------------------------------------------------------
    params = []
    in_specs = [pl.BlockSpec((tm, d0), lambda i: (i, 0))]
    for w, b in zip(weights_t, biases):
        params.append(w)
        in_specs.append(pl.BlockSpec(w.shape, lambda i: (0, 0)))
        params.append(b)
        in_specs.append(pl.BlockSpec(b.shape, lambda i: (0, 0)))
    out_spec = pl.BlockSpec((tm, d_out_pad), lambda i: (i, 0))

    # ---- explicit VMEM budget (params may be double-buffered when grid > 1) --
    param_bytes = sum(p.size * p.dtype.itemsize for p in params)
    io_bytes = 2 * (tm * d0 + tm * d_out_pad) * jnp.dtype(dtype).itemsize
    vmem_limit = int(min(max(2 * param_bytes + io_bytes + (4 << 20), 16 << 20),
                         48 << 20))

    kernel = _make_mlp_kernel(n_layers, activation, dtype)

    out_padded = pl.pallas_call(
        kernel,
        out_shape=jax.ShapeDtypeStruct((B_pad, d_out_pad), dtype),
        grid=grid,
        in_specs=in_specs,
        out_specs=out_spec,
        compiler_params=pltpu.CompilerParams(
            dimension_semantics=("parallel",),
            vmem_limit_bytes=vmem_limit,
        ),
    )(x, *params)

    return out_padded[:B, :d_out]


# ----------------------------------------------------------------------------
# Deterministic parameter init (mimics torch.nn.Linear U(-1/sqrt(in), 1/sqrt(in)))
# ----------------------------------------------------------------------------
def init_params(key, arr, dtype=jnp.float32):
    weights_t, biases = [], []
    for i in range(len(arr) - 1):
        fan_in, fan_out = arr[i], arr[i + 1]
        key, kw, kb = jax.random.split(key, 3)
        bound = 1.0 / jnp.sqrt(fan_in)
        # Stored transposed: [fan_in, fan_out]
        w_t = jax.random.uniform(kw, (fan_in, fan_out), dtype, -bound, bound)
        b = jax.random.uniform(kb, (1, fan_out), dtype, -bound, bound)
        weights_t.append(w_t)
        biases.append(b)
    return weights_t, biases


# ----------------------------------------------------------------------------
# Pure-JAX reference for correctness check
# ----------------------------------------------------------------------------
def neunet_ref(x, weights_t, biases, activation=jnp.tanh):
    h = x
    for w, b in zip(weights_t, biases):
        h = activation(h @ w + b)
    return h


if __name__ == "__main__":
    # NeuNet(arr, acti=Tanh, Dtype=float32)
    arr = [32, 64, 64, 16]
    dtype = jnp.float32
    batch = 16

    key = jax.random.PRNGKey(0)
    key, kx = jax.random.split(key)
    x = jax.random.normal(kx, (batch, arr[0]), dtype)

    weights_t, biases = init_params(key, arr, dtype)

    fwd = jax.jit(functools.partial(neunet_forward, activation=jnp.tanh))
    out = fwd(x, weights_t, biases)
    out = jax.block_until_ready(out)

    ref = neunet_ref(x, weights_t, biases)
    assert out.shape == (batch, arr[-1])
    assert out.dtype == dtype
    assert jnp.allclose(out, ref, atol=1e-5, rtol=1e-5), "mismatch vs reference"

    print("KERNEL_OK")
</pallas_src>

<mosaic_0001>
module attributes {stable_mosaic.version = 11 : i64} {
  func.func @kernel(%arg0: i32, %arg1: memref<16x32xf32, #tpu.memory_space<vmem>>, %arg2: memref<32x64xf32, #tpu.memory_space<vmem>>, %arg3: memref<1x64xf32, #tpu.memory_space<vmem>>, %arg4: memref<64x64xf32, #tpu.memory_space<vmem>>, %arg5: memref<1x64xf32, #tpu.memory_space<vmem>>, %arg6: memref<64x128xf32, #tpu.memory_space<vmem>>, %arg7: memref<1x128xf32, #tpu.memory_space<vmem>>, %arg8: memref<16x128xf32, #tpu.memory_space<vmem>>) attributes {dimension_semantics = [#tpu.dimension_semantics<parallel>], iteration_bounds = array<i64: 1>, scalar_prefetch = 0 : i64, scratch_operands = 0 : i64, tpu.core_type = #tpu.core_type<tc>, window_params = [{transform_indices = @transform_0, window_bounds = array<i64: 16, 32>}, {pipeline_mode = #tpu.pipeline_mode<synchronous>, transform_indices = @transform_1, window_bounds = array<i64: 32, 64>}, {pipeline_mode = #tpu.pipeline_mode<synchronous>, transform_indices = @transform_2, window_bounds = array<i64: 1, 64>}, {pipeline_mode = #tpu.pipeline_mode<synchronous>, transform_indices = @transform_3, window_bounds = array<i64: 64, 64>}, {pipeline_mode = #tpu.pipeline_mode<synchronous>, transform_indices = @transform_4, window_bounds = array<i64: 1, 64>}, {pipeline_mode = #tpu.pipeline_mode<synchronous>, transform_indices = @transform_5, window_bounds = array<i64: 64, 128>}, {pipeline_mode = #tpu.pipeline_mode<synchronous>, transform_indices = @transform_6, window_bounds = array<i64: 1, 128>}, {transform_indices = @transform_7, window_bounds = array<i64: 16, 128>}]} {
    %c0 = arith.constant 0 : index
    %c0_0 = arith.constant 0 : index
    %0 = vector.load %arg1[%c0, %c0_0] : memref<16x32xf32, #tpu.memory_space<vmem>>, vector<16x32xf32>
    %c0_1 = arith.constant 0 : index
    %c0_2 = arith.constant 0 : index
    %1 = vector.load %arg2[%c0_1, %c0_2] : memref<32x64xf32, #tpu.memory_space<vmem>>, vector<32x64xf32>
    %c0_3 = arith.constant 0 : index
    %c0_4 = arith.constant 0 : index
    %2 = vector.load %arg3[%c0_3, %c0_4] : memref<1x64xf32, #tpu.memory_space<vmem>>, vector<1x64xf32>
    %cst = arith.constant dense<0.000000e+00> : vector<16x64xf32>
    %3 = tpu.matmul %0, %1, %cst {dimension_numbers = #tpu.dot_dimension_numbers<[1], [0], [0], [1], [0, 0, 1, 1], [], []>} : vector<16x32xf32>, vector<32x64xf32>, vector<16x64xf32> -> vector<16x64xf32>
    %4 = vector.broadcast %2 : vector<1x64xf32> to vector<16x64xf32>
    %5 = arith.addf %3, %4 : vector<16x64xf32>
    %6 = math.tanh %5 : vector<16x64xf32>
    %c0_5 = arith.constant 0 : index
    %c0_6 = arith.constant 0 : index
    %7 = vector.load %arg4[%c0_5, %c0_6] : memref<64x64xf32, #tpu.memory_space<vmem>>, vector<64x64xf32>
    %c0_7 = arith.constant 0 : index
    %c0_8 = arith.constant 0 : index
    %8 = vector.load %arg5[%c0_7, %c0_8] : memref<1x64xf32, #tpu.memory_space<vmem>>, vector<1x64xf32>
    %cst_9 = arith.constant dense<0.000000e+00> : vector<16x64xf32>
    %9 = tpu.matmul %6, %7, %cst_9 {dimension_numbers = #tpu.dot_dimension_numbers<[1], [0], [0], [1], [0, 0, 1, 1], [], []>} : vector<16x64xf32>, vector<64x64xf32>, vector<16x64xf32> -> vector<16x64xf32>
    %10 = vector.broadcast %8 : vector<1x64xf32> to vector<16x64xf32>
    %11 = arith.addf %9, %10 : vector<16x64xf32>
    %12 = math.tanh %11 : vector<16x64xf32>
    %c0_10 = arith.constant 0 : index
    %c0_11 = arith.constant 0 : index
    %13 = vector.load %arg6[%c0_10, %c0_11] : memref<64x128xf32, #tpu.memory_space<vmem>>, vector<64x128xf32>
    %c0_12 = arith.constant 0 : index
    %c0_13 = arith.constant 0 : index
    %14 = vector.load %arg7[%c0_12, %c0_13] : memref<1x128xf32, #tpu.memory_space<vmem>>, vector<1x128xf32>
    %cst_14 = arith.constant dense<0.000000e+00> : vector<16x128xf32>
    %15 = tpu.matmul %12, %13, %cst_14 {dimension_numbers = #tpu.dot_dimension_numbers<[1], [0], [0], [1], [0, 0, 1, 1], [], []>} : vector<16x64xf32>, vector<64x128xf32>, vector<16x128xf32> -> vector<16x128xf32>
    %16 = vector.broadcast %14 : vector<1x128xf32> to vector<16x128xf32>
    %17 = arith.addf %15, %16 : vector<16x128xf32>
    %18 = math.tanh %17 : vector<16x128xf32>
    %c0_15 = arith.constant 0 : index
    %c0_16 = arith.constant 0 : index
    %19 = vector.load %arg8[%c0_15, %c0_16] : memref<16x128xf32, #tpu.memory_space<vmem>>, vector<16x128xf32>
    tpu.vector_store %arg8[%c0_15, %c0_16], %18 {strides = array<i32>} : memref<16x128xf32, #tpu.memory_space<vmem>>, vector<16x128xf32>,
    return
  }
  func.func @transform_0(%arg0: i32) -> (i32, i32) {
    %c0_i32 = arith.constant 0 : i32
    %c0_i32_0 = arith.constant 0 : i32
    return %arg0, %c0_i32 : i32, i32
  }
  func.func @transform_1(%arg0: i32) -> (i32, i32) {
    %c0_i32 = arith.constant 0 : i32
    %c0_i32_0 = arith.constant 0 : i32
    %c0_i32_1 = arith.constant 0 : i32
    return %c0_i32, %c0_i32_0 : i32, i32
  }
  func.func @transform_2(%arg0: i32) -> (i32, i32) {
    %c0_i32 = arith.constant 0 : i32
    %c0_i32_0 = arith.constant 0 : i32
    %c0_i32_1 = arith.constant 0 : i32
    return %c0_i32, %c0_i32_0 : i32, i32
  }
  func.func @transform_3(%arg0: i32) -> (i32, i32) {
    %c0_i32 = arith.constant 0 : i32
    %c0_i32_0 = arith.constant 0 : i32
    %c0_i32_1 = arith.constant 0 : i32
    return %c0_i32, %c0_i32_0 : i32, i32
  }
  func.func @transform_4(%arg0: i32) -> (i32, i32) {
    %c0_i32 = arith.constant 0 : i32
    %c0_i32_0 = arith.constant 0 : i32
    %c0_i32_1 = arith.constant 0 : i32
    return %c0_i32, %c0_i32_0 : i32, i32
  }
  func.func @transform_5(%arg0: i32) -> (i32, i32) {
    %c0_i32 = arith.constant 0 : i32
    %c0_i32_0 = arith.constant 0 : i32
    %c0_i32_1 = arith.constant 0 : i32
    return %c0_i32, %c0_i32_0 : i32, i32
  }
  func.func @transform_6(%arg0: i32) -> (i32, i32) {
    %c0_i32 = arith.constant 0 : i32
    %c0_i32_0 = arith.constant 0 : i32
    %c0_i32_1 = arith.constant 0 : i32
    return %c0_i32, %c0_i32_0 : i32, i32
  }
  func.func @transform_7(%arg0: i32) -> (i32, i32) {
    %c0_i32 = arith.constant 0 : i32
    %c0_i32_0 = arith.constant 0 : i32
    return %arg0, %c0_i32 : i32, i32
  }
}

</mosaic_0001>

<bundles_post_ra>
// kernel: neunet_forward.1
= control target key start
LH: loop header
LB: loop body
LE: loop exit
PB: predicated region body
PF: predicated region fallthrough
CT: control target
= control target key end

     0   :  { %vm40_vm0 = vcmask 261120   ;;  %s636_s0 = inlined_call_operand.vmem [shape: f32[16,32], index: 0, kind: input, shape index: {}]   ;;  %s637_s1 = inlined_call_operand.vmem [shape: f32[32,64], index: 1, kind: input, shape index: {}]   ;;  %s638_s2 = inlined_call_operand.vmem [shape: f32[1,64], index: 2, kind: input, shape index: {}]   ;;  %s639_s3 = inlined_call_operand.vmem [shape: f32[64,64], index: 3, kind: input, shape index: {}]   ;;  %s640_s4 = inlined_call_operand.vmem [shape: f32[1,64], index: 4, kind: input, shape index: {}]   ;;  %s641_s5 = inlined_call_operand.vmem [shape: f32[64,128], index: 5, kind: input, shape index: {}]   ;;  %s642_s6 = inlined_call_operand.vmem [shape: f32[1,128], index: 6, kind: input, shape index: {}]   ;;  %s643_s7 = inlined_call_operand.hbm [shape: f32[16,128], index: 7, kind: output, shape index: {}]  }
   0x1   :  { %v29_v0 = vld [vmem:[%s637_s1] sm:$0xff]  ;;  %v30_v1 = vld [vmem:[%s637_s1 + $0x8] sm:$0xff]  ;;  %v31_v2 = vld [vmem:[%s637_s1 + $0x10] sm:$0xff] }
   0x2   :  { %v423_v3 = vpack.c.bf16 %v30_v1, %v29_v0  ;;  %v32_v4 = vld [vmem:[%s637_s1 + $0x18] sm:$0xff]  ;;  %v27_v5 = vld [vmem:[%s636_s0] sm:$0xff] }
   0x3   :  { %v427_v6 = vpack.c.bf16 %v32_v4, %v31_v2  ;;  %382 = vmatprep.mubr.msk.f32.mxu0 %vm40_vm0, %v27_v5 }
   0x4   :  { %12 = vsyncpa [#allocation3], 0  ;;  %424 = vmatprep.subr.bf16.mxu0 %v423_v3  ;;  %v28_v7 = vld [vmem:[%s636_s0 + $0x8] sm:$0xff]  ;;  %v124_v8 = vld [vmem:[%s639_s3] sm:$0xff]  ;;  %vm139_vm1 = vcmask 523264  }
   0x5   :  { %426 = vmatpush3.bf16.msra.mxu0 %v423_v3  ;;  %v125_v9 = vld [vmem:[%s639_s3 + $0x8] sm:$0xff]  ;;  %v126_v11 = vld [vmem:[%s639_s3 + $0x10] sm:$0xff]  ;;  %v127_v12 = vld [vmem:[%s639_s3 + $0x18] sm:$0xff] }
   0x6   :  { %428 = vmatprep.subr.bf16.mxu0 %v427_v6  ;;  %v431_v10 = vpack.c.bf16 %v125_v9, %v124_v8  ;;  %v435_v13 = vpack.c.bf16 %v127_v12, %v126_v11  ;;  %v128_v14 = vld [vmem:[%s639_s3 + $0x20] sm:$0xff]  ;;  %v129_v15 = vld [vmem:[%s639_s3 + $0x28] sm:$0xff]  ;;  %v130_v16 = vld [vmem:[%s639_s3 + $0x30] sm:$0xff] }
   0x7   :  { %v439_v17 = vpack.c.bf16 %v129_v15, %v128_v14  ;;  %v131_v18 = vld [vmem:[%s639_s3 + $0x38] sm:$0xff]  ;;  %v339_v20 = vld [vmem:[%s638_s2] ss:$0 sm:$0xff]  ;;  %v224_v28 = vld [vmem:[%s641_s5 + $0x8] sm:$0xff] }
   0x8   :  { %432 = vmatprep.subr.bf16.mxu1 %v431_v10  ;;  %v443_v19 = vpack.c.bf16 %v131_v18, %v130_v16  ;;  %v223_v27 = vld [vmem:[%s641_s5] sm:$0xff]  ;;  %v225_v30 = vld [vmem:[%s641_s5 + $0x10] sm:$0xff]  ;;  %v226_v31 = vld [vmem:[%s641_s5 + $0x18] sm:$0xff] }
   0x9   :  { %430 = vmatpush3.bf16.msra.mxu0 %v427_v6  ;;  %434 = vmatpush3.bf16.msra.mxu1 %v431_v10  ;;  %v447_v29 = vpack.c.bf16 %v224_v28, %v223_v27  ;;  %v451_v32 = vpack.c.bf16 %v226_v31, %v225_v30  ;;  %v227_v33 = vld [vmem:[%s641_s5 + $0x20] sm:$0xff]  ;;  %v228_v34 = vld [vmem:[%s641_s5 + $0x28] sm:$0xff]  ;;  %v229_v35 = vld [vmem:[%s641_s5 + $0x30] sm:$0xff] }
   0xa   :  { %436 = vmatprep.subr.bf16.mxu1 %v435_v13  ;;  %v455_v36 = vpack.c.bf16 %v228_v34, %v227_v33  ;;  %v230_v37 = vld [vmem:[%s641_s5 + $0x38] sm:$0xff]  ;;  %v342_v39 = vld [vmem:[%s640_s4] ss:$0 sm:$0xff]  ;;  %s502_s4 = smov [#allocation2]  }
   0xb   :  { %448 = vmatprep.subr.bf16.mxu0 %v447_v29  ;;  %v459_v38 = vpack.c.bf16 %v230_v37, %v229_v35  ;;  %v345_v46 = vld [vmem:[%s642_s6] ss:$0 sm:$0xff]  ;;  %s328_s21 = sshll.u32 %s502_s4, 4  ;;  %s329_s21 = int_to_ptr.vmem [resolvable:$true] %s328_s21 }
   0xc   :  { %383 = vmatmul.mubr.msk.f32.vlgmr.msra.gmra.mrb[0].mxu0 %vm40_vm0, %v28_v7  ;;  %s478_s22 = scalar_lea.vmem %s329_s21, 256  ;;  %p483_p1 = scmp.lt.s32.totalorder %s329_s21, %s329_s21 }
   0xd   :  { %438 = vmatpush3.bf16.msra.mxu1 %v435_v13  ;;  %450 = vmatpush3.bf16.msra.mxu0 %v447_v29  ;;  %p479_p0 = scmp.ne.s32.totalorder %s329_s21, %s478_s22  ;;  %p484_p2 = scmp.lt.s32.totalorder %s478_s22, %s478_s22 }
   0xe   :  { %440 = vmatprep.subr.bf16.mxu1 %v439_v17  ;;  %452 = vmatprep.subr.bf16.mxu0 %v451_v32 }
   0xf   :  { %p485_p3 = por %p484_p2, %p483_p1 }
  0x11   :  { %442 = vmatpush3.bf16.msra.mxu1 %v439_v17  ;;  %454 = vmatpush3.bf16.msra.mxu0 %v451_v32  ;;  %p486_p4 = pnand %p485_p3, %p479_p0 }
  0x12   :  { %444 = vmatprep.subr.bf16.mxu1 %v443_v19  ;;  %456 = vmatprep.subr.bf16.mxu0 %v455_v36 }
  0x15   :  { %446 = vmatpush3.bf16.msra.mxu1 %v443_v19  ;;  %458 = vmatpush3.bf16.msra.mxu0 %v455_v36 }
  0x16   :  { %460 = vmatprep.subr.bf16.mxu0 %v459_v38 }
  0x19   :  { %462 = vmatpush3.bf16.msra.mxu0 %v459_v38 }
  0xdf   :  { %v384_v21 = vpop.f32.mrb[0].mxu0 }
  0xe0   :  { %v119_v22 = vadd.f32 %v384_v21, %v339_v20  ;;  %v113_v23 = vpop.f32.mrb[1].mxu0 }
  0xe1   :  { %v114_v24 = vadd.f32 %v339_v20, %v113_v23 }
  0xe3   :  { %466 = vtanh.f32 %v114_v24 }
  0xe4   :  { %468 = vtanh.f32 %v119_v22 }
  0xed   :  { %v467_v25 = vpop.eup %466 }
  0xee   :  { %v469_v26 = vpop.eup %468  ;;  %401 = vmatprep.mubr.msk.f32.mxu1 %vm139_vm1, %v467_v25 }
  0xef   :  { %402 = vmatmul.mubr.msk.f32.vlgmr.msra.gmra.mrb[0].mxu1 %vm139_vm1, %v469_v26 }
 0x1c2   :  { %v403_v40 = vpop.f32.mrb[0].mxu1 }
 0x1c3   :  { %v218_v41 = vadd.f32 %v403_v40, %v342_v39  ;;  %v212_v42 = vpop.f32.mrb[1].mxu1 }
 0x1c4   :  { %v213_v43 = vadd.f32 %v342_v39, %v212_v42 }
 0x1c6   :  { %470 = vtanh.f32 %v213_v43 }
 0x1c7   :  { %472 = vtanh.f32 %v218_v41 }
 0x1d0   :  { %v471_v44 = vpop.eup %470 }
 0x1d1   :  { %v473_v45 = vpop.eup %472  ;;  %420 = vmatprep.mubr.msk.f32.mxu0 %vm139_vm1, %v471_v44 }
 0x1d2   :  { %421 = vmatmul.mubr.msk.f32.vlgmr.msra.gmra.mrb[2].mxu0 %vm139_vm1, %v473_v45 }
 0x2a5   :  { %v422_v47 = vpop.f32.mrb[2].mxu0 }
 0x2a6   :  { %v316_v48 = vadd.f32 %v422_v47, %v345_v46  ;;  %v310_v49 = vpop.f32.mrb[3].mxu0 }
 0x2a7   :  { %v311_v50 = vadd.f32 %v345_v46, %v310_v49 }
 0x2a8   :  { %474 = vtanh.f32 %v316_v48 }
 0x2a9   :  { %476 = vtanh.f32 %v311_v50 }
 0x2b2   :  { %v475_v51 = vpop.eup %474 }
 0x2b3   :  { %v477_v52 = vpop.eup %476  ;;  %322 = vst [vmem:[#allocation2 + $0x8] sm:$0xff] %v475_v51 }
 0x2b4   :  { %321 = vst [vmem:[#allocation2] sm:$0xff] %v477_v52 }
 0x2b5   :  { %489 = shalt.err (!%p486_p4)
}
 0x2b6   :  { %s490_s24 = scalar_lea.hbm %s643_s7, 256 }
 0x2b7   :  { %p491_p5 = scmp.ne.s32.totalorder %s643_s7, %s490_s24  ;;  %p494_p6 = scmp.lt.u32.totalorder %s490_s24, %s643_s7 }
 0x2b9   :  { %p496_p7 = pnand %p494_p6, %p491_p5 }
 0x2bb   :  { %499 = shalt.err (!%p496_p7)
}
 0x2bc   :  { %s503_s3 = smov 128   ;;  %s504_s29 = smov 8  }
 0x2bd   :  { %334 = dma.vmem_to_hbm [thread:$0]  %s329_s21, 256, %s643_s7, [#allocation3], %s503_s3, %s503_s3, %s504_s29  }
 0x2be   :  { %500 = dma.done.wait [#allocation3], 256  }
 0x2bf   :  { %501 = vsyncadd [#allocation3], 4294967040 }
 0x2c0   :  { %338 = vsyncpa [#allocation3], 1 }

</bundles_post_ra>
